<compile_context>
chip_gen: v6e
topology: v6e:2x2x1
jax: 0.10.0
libtpu: 0.0.40
codegen_flags: <defaults>
</compile_context>

<pallas_src>
import jax
import jax.numpy as jnp
from jax.experimental import pallas as pl
from jax.experimental.pallas import tpu as pltpu


def _decoder_lstm_kernel(y0_ref, h0_ref, c0_ref,
                         wih_ref, whh_ref, b_ref, wout_ref, bout_ref,
                         yhat_ref, hout_ref, cout_ref,
                         x_sc, h_sc, c_sc):
    B, H = h0_ref.shape
    OUT = y0_ref.shape[1]
    T_TILE = yhat_ref.shape[1] // OUT

    # Initialize the recurrent carry (kept in VMEM scratch across the grid).
    @pl.when(pl.program_id(0) == 0)
    def _init():
        x_sc[...] = y0_ref[...]
        h_sc[...] = h0_ref[...]
        c_sc[...] = c0_ref[...]

    # Loop-invariant loads / broadcasts, hoisted out of the time loop.
    w_ih = wih_ref[...]                                   # (OUT, 4H)
    w_hh = whh_ref[...]                                   # (H,   4H)
    bias = jnp.broadcast_to(b_ref[...], (B, 4 * H))       # (B,   4H)
    w_out = wout_ref[...]                                 # (OUT, H)
    b_out = jnp.broadcast_to(bout_ref[...], (B, OUT))     # (B,   OUT)
    # NOTE: for larger H, casting h / w_hh to bf16 (keeping the f32 accumulate
    # and f32 gate math) would help the v6e/v7x 256x256 MXU; at H=32 the
    # recurrence is latency-bound, so f32 operands are kept for accuracy.

    @pl.loop(0, T_TILE)
    def _step(t):
        x = x_sc[...]            # (B, OUT)
        h = h_sc[...]            # (B, H)
        c = c_sc[...]            # (B, H)

        # Input contribution: K == 1 is a rank-1 outer product -> VPU, not MXU.
        if OUT == 1:
            gates_x = x * w_ih                                   # (B, 4H)
        else:
            gates_x = jnp.dot(x, w_ih, preferred_element_type=jnp.float32)

        gates = (gates_x
                 + jnp.dot(h, w_hh, preferred_element_type=jnp.float32)
                 + bias)                                         # (B, 4H)

        i_g = jax.nn.sigmoid(gates[:, 0:H])
        f_g = jax.nn.sigmoid(gates[:, H:2 * H])
        g_g = jnp.tanh(gates[:, 2 * H:3 * H])
        o_g = jax.nn.sigmoid(gates[:, 3 * H:4 * H])

        c_new = f_g * c + i_g * g_g
        h_new = o_g * jnp.tanh(c_new)

        # Output head: N == 1 -> VPU multiply + lane reduce, no MXU round trip.
        if OUT == 1:
            y_hat = jnp.sum(h_new * w_out, axis=-1, keepdims=True) + b_out
        else:
            y_hat = jnp.einsum('bh,oh->bo', h_new, w_out,
                               preferred_element_type=jnp.float32) + b_out

        h_sc[...] = h_new
        c_sc[...] = c_new
        x_sc[...] = y_hat                 # autoregressive: next input = y_hat
        # Write into the lane-dense (B, T_TILE) VMEM output slab; the HBM
        # writeback of this slab happens once per grid step.
        yhat_ref[:, pl.ds(t * OUT, OUT)] = y_hat.astype(yhat_ref.dtype)

    # Final state: written to the (VMEM-resident, constant-index) output block;
    # HBM writeback happens once after the last grid step.
    hout_ref[...] = h_sc[...].astype(hout_ref.dtype)
    cout_ref[...] = c_sc[...].astype(cout_ref.dtype)


def decoder_lstm_decode(y0, hidden_cell, params, num_steps):
    """Fused autoregressive decode of `num_steps` DecoderLSTM forward steps.

    Each step is exactly the PyTorch module's forward (LSTMCell + Linear);
    the next step's input is the previous step's y_hat.
    Returns (y_hat_seq (B, T, OUT), (h_T, c_T)).
    """
    h0, c0 = hidden_cell
    w_ih_t, w_hh_t, b, w_out, b_out = params
    B, OUT = y0.shape
    H = h0.shape[1]
    T = int(num_steps)

    # Lane-dense output tiling over time: 128 steps per tile when possible,
    # otherwise a single full-extent tile (always satisfies the (8,128) rule).
    t_tile = 128 if (T > 128 and T % 128 == 0) else T
    grid = (T // t_tile,)

    const_map = lambda i: (0, 0)

    y_hat_seq, h_t, c_t = pl.pallas_call(
        _decoder_lstm_kernel,
        out_shape=(
            jax.ShapeDtypeStruct((B, T * OUT), jnp.float32),
            jax.ShapeDtypeStruct((B, H), jnp.float32),
            jax.ShapeDtypeStruct((B, H), jnp.float32),
        ),
        grid_spec=pltpu.PrefetchScalarGridSpec(
            num_scalar_prefetch=0,
            grid=grid,
            in_specs=[
                pl.BlockSpec((B, OUT), const_map),       # y0
                pl.BlockSpec((B, H), const_map),         # h0
                pl.BlockSpec((B, H), const_map),         # c0
                pl.BlockSpec((OUT, 4 * H), const_map),   # W_ih^T (VMEM-resident)
                pl.BlockSpec((H, 4 * H), const_map),     # W_hh^T (VMEM-resident)
                pl.BlockSpec((1, 4 * H), const_map),     # b = b_ih + b_hh
                pl.BlockSpec((OUT, H), const_map),       # W_out
                pl.BlockSpec((1, OUT), const_map),       # b_out
            ],
            out_specs=(
                pl.BlockSpec((B, t_tile * OUT), lambda i: (0, i)),  # y_hat slab
                pl.BlockSpec((B, H), const_map),                    # h_T
                pl.BlockSpec((B, H), const_map),                    # c_T
            ),
            scratch_shapes=[
                pltpu.VMEM((B, OUT), jnp.float32),   # x carry (next input)
                pltpu.VMEM((B, H), jnp.float32),     # h carry
                pltpu.VMEM((B, H), jnp.float32),     # c carry
            ],
        ),
        compiler_params=pltpu.CompilerParams(
            dimension_semantics=("arbitrary",)),     # steps are sequential
    )(y0, h0, c0, w_ih_t, w_hh_t, b, w_out, b_out)

    return y_hat_seq.reshape(B, T, OUT), (h_t, c_t)


def decoder_lstm_step(y, hidden_cell, params, attn_context=None):
    """Single DecoderLSTM forward step (matches the PyTorch module's forward)."""
    if attn_context is not None:
        # TODO(synk): attn_context concat changes the LSTMCell input width and
        # shape-mismatches LSTMCell(output_size, hidden) in the reference too.
        raise NotImplementedError("attn_context is not supported")
    y_hat_seq, (h1, c1) = decoder_lstm_decode(y, hidden_cell, params, num_steps=1)
    return y_hat_seq[:, 0, :], (h1, c1)


def init_params(key, hidden_size, output_size=1):
    """Deterministic init matching the PyTorch parameter shapes."""
    k = jax.random.split(key, 6)
    bound = 1.0 / jnp.sqrt(hidden_size)
    w_ih = jax.random.uniform(k[0], (4 * hidden_size, output_size),
                              jnp.float32, -bound, bound)
    w_hh = jax.random.uniform(k[1], (4 * hidden_size, hidden_size),
                              jnp.float32, -bound, bound)
    b_ih = jax.random.uniform(k[2], (4 * hidden_size,), jnp.float32, -bound, bound)
    b_hh = jax.random.uniform(k[3], (4 * hidden_size,), jnp.float32, -bound, bound)
    w_out = jax.random.uniform(k[4], (output_size, hidden_size),
                               jnp.float32, -bound, bound)
    b_out = jax.random.uniform(k[5], (output_size,), jnp.float32, -bound, bound)
    return (w_ih.T,                               # (output_size, 4H)
            w_hh.T,                               # (H, 4H)
            (b_ih + b_hh).reshape(1, -1),         # (1, 4H)
            w_out,                                # (output_size, H)
            b_out.reshape(1, -1))                 # (1, output_size)


# ----------------------------- pure-JAX reference -----------------------------
def _reference_step(y, hidden_cell, params):
    h, c = hidden_cell
    w_ih_t, w_hh_t, b, w_out, b_out = params
    H = h.shape[1]
    gates = y @ w_ih_t + h @ w_hh_t + b
    i = jax.nn.sigmoid(gates[:, :H])
    f = jax.nn.sigmoid(gates[:, H:2 * H])
    g = jnp.tanh(gates[:, 2 * H:3 * H])
    o = jax.nn.sigmoid(gates[:, 3 * H:])
    c_new = f * c + i * g
    h_new = o * jnp.tanh(c_new)
    y_hat = (h_new @ w_out.T + b_out).reshape(-1, w_out.shape[0])
    return y_hat, (h_new, c_new)


def _reference_decode(y0, hidden_cell, params, num_steps):
    y, hc = y0, hidden_cell
    outs = []
    for _ in range(num_steps):
        y, hc = _reference_step(y, hc, params)
        outs.append(y)
    return jnp.stack(outs, axis=1), hc   # (B, T, OUT)


if __name__ == "__main__":
    B, H, OUT, T = 2, 32, 1, 256
    key = jax.random.PRNGKey(0)
    k_y, k_h, k_c, k_p = jax.random.split(key, 4)

    y0 = jax.random.normal(k_y, (B, OUT), jnp.float32)
    h0 = jax.random.normal(k_h, (B, H), jnp.float32)
    c0 = jax.random.normal(k_c, (B, H), jnp.float32)
    params = init_params(k_p, H, OUT)

    # Single step (exact module forward semantics).
    y1, (h1, c1) = decoder_lstm_step(y0, (h0, c0), params)
    jax.block_until_ready((y1, h1, c1))
    ry1, (rh1, rc1) = _reference_step(y0, (h0, c0), params)
    assert jnp.allclose(y1, ry1, atol=1e-5), "single-step y_hat mismatch"
    assert jnp.allclose(h1, rh1, atol=1e-5), "single-step h mismatch"
    assert jnp.allclose(c1, rc1, atol=1e-5), "single-step c mismatch"

    # Fused autoregressive decode of T steps in one kernel launch.
    yseq, (hT, cT) = decoder_lstm_decode(y0, (h0, c0), params, num_steps=T)
    jax.block_until_ready((yseq, hT, cT))
    ryseq, (rhT, rcT) = _reference_decode(y0, (h0, c0), params, T)
    assert jnp.allclose(yseq, ryseq, atol=1e-3, rtol=1e-3), "decode y_hat mismatch"
    assert jnp.allclose(hT, rhT, atol=1e-3, rtol=1e-3), "decode h_T mismatch"
    assert jnp.allclose(cT, rcT, atol=1e-3, rtol=1e-3), "decode c_T mismatch"

    print("KERNEL_OK")
</pallas_src>

<mosaic_0001>
module attributes {stable_mosaic.version = 11 : i64} {
  func.func @_decoder_lstm_kernel(%arg0: i32, %arg1: memref<2x1xf32, #tpu.memory_space<vmem>>, %arg2: memref<2x32xf32, #tpu.memory_space<vmem>>, %arg3: memref<2x32xf32, #tpu.memory_space<vmem>>, %arg4: memref<1x128xf32, #tpu.memory_space<vmem>>, %arg5: memref<32x128xf32, #tpu.memory_space<vmem>>, %arg6: memref<1x128xf32, #tpu.memory_space<vmem>>, %arg7: memref<1x32xf32, #tpu.memory_space<vmem>>, %arg8: memref<1x1xf32, #tpu.memory_space<vmem>>, %arg9: memref<2x1xf32, #tpu.memory_space<vmem>>, %arg10: memref<2x32xf32, #tpu.memory_space<vmem>>, %arg11: memref<2x32xf32, #tpu.memory_space<vmem>>, %arg12: memref<2x1xf32, #tpu.memory_space<vmem>>, %arg13: memref<2x32xf32, #tpu.memory_space<vmem>>, %arg14: memref<2x32xf32, #tpu.memory_space<vmem>>) attributes {dimension_semantics = [#tpu.dimension_semantics<arbitrary>], iteration_bounds = array<i64: 1>, scalar_prefetch = 0 : i64, scratch_operands = 3 : i64, tpu.core_type = #tpu.core_type<tc>, window_params = [{pipeline_mode = #tpu.pipeline_mode<synchronous>, transform_indices = @transform_0, window_bounds = array<i64: 2, 1>}, {pipeline_mode = #tpu.pipeline_mode<synchronous>, transform_indices = @transform_1, window_bounds = array<i64: 2, 32>}, {pipeline_mode = #tpu.pipeline_mode<synchronous>, transform_indices = @transform_2, window_bounds = array<i64: 2, 32>}, {pipeline_mode = #tpu.pipeline_mode<synchronous>, transform_indices = @transform_3, window_bounds = array<i64: 1, 128>}, {pipeline_mode = #tpu.pipeline_mode<synchronous>, transform_indices = @transform_4, window_bounds = array<i64: 32, 128>}, {pipeline_mode = #tpu.pipeline_mode<synchronous>, transform_indices = @transform_5, window_bounds = array<i64: 1, 128>}, {pipeline_mode = #tpu.pipeline_mode<synchronous>, transform_indices = @transform_6, window_bounds = array<i64: 1, 32>}, {pipeline_mode = #tpu.pipeline_mode<synchronous>, transform_indices = @transform_7, window_bounds = array<i64: 1, 1>}, {transform_indices = @transform_8, window_bounds = array<i64: 2, 1>}, {pipeline_mode = #tpu.pipeline_mode<synchronous>, transform_indices = @transform_9, window_bounds = array<i64: 2, 32>}, {pipeline_mode = #tpu.pipeline_mode<synchronous>, transform_indices = @transform_10, window_bounds = array<i64: 2, 32>}]} {
    %c0_i32 = arith.constant 0 : i32
    %0 = arith.cmpi eq, %arg0, %c0_i32 : i32
    %1 = arith.extui %0 : i1 to i32
    %c0_i32_0 = arith.constant 0 : i32
    %2 = arith.cmpi ne, %1, %c0_i32_0 : i32
    scf.if %2 {
      %c0_39 = arith.constant 0 : index
      %c0_40 = arith.constant 0 : index
      %63 = vector.load %arg1[%c0_39, %c0_40] : memref<2x1xf32, #tpu.memory_space<vmem>>, vector<2x1xf32>
      %c0_41 = arith.constant 0 : index
      %c0_42 = arith.constant 0 : index
      %64 = vector.load %arg12[%c0_41, %c0_42] : memref<2x1xf32, #tpu.memory_space<vmem>>, vector<2x1xf32>
      tpu.vector_store %arg12[%c0_41, %c0_42], %63 {strides = array<i32>} : memref<2x1xf32, #tpu.memory_space<vmem>>, vector<2x1xf32>,
      %c0_43 = arith.constant 0 : index
      %c0_44 = arith.constant 0 : index
      %65 = vector.load %arg2[%c0_43, %c0_44] : memref<2x32xf32, #tpu.memory_space<vmem>>, vector<2x32xf32>
      %c0_45 = arith.constant 0 : index
      %c0_46 = arith.constant 0 : index
      %66 = vector.load %arg13[%c0_45, %c0_46] : memref<2x32xf32, #tpu.memory_space<vmem>>, vector<2x32xf32>
      tpu.vector_store %arg13[%c0_45, %c0_46], %65 {strides = array<i32>} : memref<2x32xf32, #tpu.memory_space<vmem>>, vector<2x32xf32>,
      %c0_47 = arith.constant 0 : index
      %c0_48 = arith.constant 0 : index
      %67 = vector.load %arg3[%c0_47, %c0_48] : memref<2x32xf32, #tpu.memory_space<vmem>>, vector<2x32xf32>
      %c0_49 = arith.constant 0 : index
      %c0_50 = arith.constant 0 : index
      %68 = vector.load %arg14[%c0_49, %c0_50] : memref<2x32xf32, #tpu.memory_space<vmem>>, vector<2x32xf32>
      tpu.vector_store %arg14[%c0_49, %c0_50], %67 {strides = array<i32>} : memref<2x32xf32, #tpu.memory_space<vmem>>, vector<2x32xf32>,
    } else {
    }
    %c0 = arith.constant 0 : index
    %c0_1 = arith.constant 0 : index
    %3 = vector.load %arg4[%c0, %c0_1] : memref<1x128xf32, #tpu.memory_space<vmem>>, vector<1x128xf32>
    %c0_2 = arith.constant 0 : index
    %c0_3 = arith.constant 0 : index
    %4 = vector.load %arg5[%c0_2, %c0_3] : memref<32x128xf32, #tpu.memory_space<vmem>>, vector<32x128xf32>
    %c0_4 = arith.constant 0 : index
    %c0_5 = arith.constant 0 : index
    %5 = vector.load %arg6[%c0_4, %c0_5] : memref<1x128xf32, #tpu.memory_space<vmem>>, vector<1x128xf32>
    %6 = vector.shape_cast %5 : vector<1x128xf32> to vector<1x128xf32>
    %7 = vector.broadcast %6 : vector<1x128xf32> to vector<2x128xf32>
    %c0_6 = arith.constant 0 : index
    %c0_7 = arith.constant 0 : index
    %8 = vector.load %arg7[%c0_6, %c0_7] : memref<1x32xf32, #tpu.memory_space<vmem>>, vector<1x32xf32>
    %c0_8 = arith.constant 0 : index
    %c0_9 = arith.constant 0 : index
    %9 = vector.load %arg8[%c0_8, %c0_9] : memref<1x1xf32, #tpu.memory_space<vmem>>, vector<1x1xf32>
    %10 = vector.shape_cast %9 : vector<1x1xf32> to vector<1x1xf32>
    %11 = vector.broadcast %10 : vector<1x1xf32> to vector<2x1xf32>
    %c0_i32_10 = arith.constant 0 : i32
    %c1_i32 = arith.constant 1 : i32
    %12 = arith.muli %c0_i32_10, %c1_i32 : i32
    %c0_i32_11 = arith.constant 0 : i32
    %13 = arith.addi %c0_i32_11, %12 : i32
    %c0_12 = arith.constant 0 : index
    %c0_13 = arith.constant 0 : index
    %14 = vector.load %arg12[%c0_12, %c0_13] : memref<2x1xf32, #tpu.memory_space<vmem>>, vector<2x1xf32>
    %c0_14 = arith.constant 0 : index
    %c0_15 = arith.constant 0 : index
    %15 = vector.load %arg13[%c0_14, %c0_15] : memref<2x32xf32, #tpu.memory_space<vmem>>, vector<2x32xf32>
    %c0_16 = arith.constant 0 : index
    %c0_17 = arith.constant 0 : index
    %16 = vector.load %arg14[%c0_16, %c0_17] : memref<2x32xf32, #tpu.memory_space<vmem>>, vector<2x32xf32>
    %17 = vector.broadcast %14 : vector<2x1xf32> to vector<2x128xf32>
    %18 = vector.broadcast %3 : vector<1x128xf32> to vector<2x128xf32>
    %19 = arith.mulf %17, %18 : vector<2x128xf32>
    %cst = arith.constant dense<0.000000e+00> : vector<2x128xf32>
    %20 = tpu.matmul %15, %4, %cst {dimension_numbers = #tpu.dot_dimension_numbers<[1], [0], [0], [1], [0, 0, 1, 1], [], []>} : vector<2x32xf32>, vector<32x128xf32>, vector<2x128xf32> -> vector<2x128xf32>
    %21 = arith.addf %19, %20 : vector<2x128xf32>
    %22 = arith.addf %21, %7 : vector<2x128xf32>
    %23 = vector.extract_strided_slice %22 {offsets = [0, 0], sizes = [2, 32], strides = [1, 1]} : vector<2x128xf32> to vector<2x32xf32>
    %24 = arith.negf %23 : vector<2x32xf32>
    %25 = math.exp %24 : vector<2x32xf32>
    %cst_18 = arith.constant 1.000000e+00 : f32
    %26 = vector.broadcast %cst_18 : f32 to vector<2x32xf32>
    %27 = arith.addf %26, %25 : vector<2x32xf32>
    %28 = arith.divf %26, %27 : vector<2x32xf32>
    %29 = vector.extract_strided_slice %22 {offsets = [0, 32], sizes = [2, 32], strides = [1, 1]} : vector<2x128xf32> to vector<2x32xf32>
    %30 = arith.negf %29 : vector<2x32xf32>
    %31 = math.exp %30 : vector<2x32xf32>
    %cst_19 = arith.constant 1.000000e+00 : f32
    %32 = vector.broadcast %cst_19 : f32 to vector<2x32xf32>
    %33 = arith.addf %32, %31 : vector<2x32xf32>
    %34 = arith.divf %32, %33 : vector<2x32xf32>
    %35 = vector.extract_strided_slice %22 {offsets = [0, 64], sizes = [2, 32], strides = [1, 1]} : vector<2x128xf32> to vector<2x32xf32>
    %36 = math.tanh %35 : vector<2x32xf32>
    %37 = vector.extract_strided_slice %22 {offsets = [0, 96], sizes = [2, 32], strides = [1, 1]} : vector<2x128xf32> to vector<2x32xf32>
    %38 = arith.negf %37 : vector<2x32xf32>
    %39 = math.exp %38 : vector<2x32xf32>
    %cst_20 = arith.constant 1.000000e+00 : f32
    %40 = vector.broadcast %cst_20 : f32 to vector<2x32xf32>
    %41 = arith.addf %40, %39 : vector<2x32xf32>
    %42 = arith.divf %40, %41 : vector<2x32xf32>
    %43 = arith.mulf %34, %16 : vector<2x32xf32>
    %44 = arith.mulf %28, %36 : vector<2x32xf32>
    %45 = arith.addf %43, %44 : vector<2x32xf32>
    %46 = math.tanh %45 : vector<2x32xf32>
    %47 = arith.mulf %42, %46 : vector<2x32xf32>
    %48 = vector.broadcast %8 : vector<1x32xf32> to vector<2x32xf32>
    %49 = arith.mulf %47, %48 : vector<2x32xf32>
    %cst_21 = arith.constant dense<0.000000e+00> : vector<2xf32>
    %50 = vector.multi_reduction <add>, %49, %cst_21 [1] : vector<2x32xf32> to vector<2xf32>
    %51 = vector.shape_cast %50 : vector<2xf32> to vector<2x1xf32>
    %52 = arith.addf %51, %11 : vector<2x1xf32>
    %c0_22 = arith.constant 0 : index
    %c0_23 = arith.constant 0 : index
    %53 = vector.load %arg13[%c0_22, %c0_23] : memref<2x32xf32, #tpu.memory_space<vmem>>, vector<2x32xf32>
    tpu.vector_store %arg13[%c0_22, %c0_23], %47 {strides = array<i32>} : memref<2x32xf32, #tpu.memory_space<vmem>>, vector<2x32xf32>,
    %c0_24 = arith.constant 0 : index
    %c0_25 = arith.constant 0 : index
    %54 = vector.load %arg14[%c0_24, %c0_25] : memref<2x32xf32, #tpu.memory_space<vmem>>, vector<2x32xf32>
    tpu.vector_store %arg14[%c0_24, %c0_25], %45 {strides = array<i32>} : memref<2x32xf32, #tpu.memory_space<vmem>>, vector<2x32xf32>,
    %c0_26 = arith.constant 0 : index
    %c0_27 = arith.constant 0 : index
    %55 = vector.load %arg12[%c0_26, %c0_27] : memref<2x1xf32, #tpu.memory_space<vmem>>, vector<2x1xf32>
    tpu.vector_store %arg12[%c0_26, %c0_27], %52 {strides = array<i32>} : memref<2x1xf32, #tpu.memory_space<vmem>>, vector<2x1xf32>,
    %c1_i32_28 = arith.constant 1 : i32
    %56 = arith.muli %13, %c1_i32_28 : i32
    %c0_29 = arith.constant 0 : index
    %57 = arith.index_cast %56 : i32 to index
    %58 = vector.load %arg9[%c0_29, %57] : memref<2x1xf32, #tpu.memory_space<vmem>>, vector<2x1xf32>
    tpu.vector_store %arg9[%c0_29, %57], %52 {strides = array<i32>} : memref<2x1xf32, #tpu.memory_space<vmem>>, vector<2x1xf32>,
    %c1_i32_30 = arith.constant 1 : i32
    %c0_31 = arith.constant 0 : index
    %c0_32 = arith.constant 0 : index
    %59 = vector.load %arg13[%c0_31, %c0_32] : memref<2x32xf32, #tpu.memory_space<vmem>>, vector<2x32xf32>
    %c0_33 = arith.constant 0 : index
    %c0_34 = arith.constant 0 : index
    %60 = vector.load %arg10[%c0_33, %c0_34] : memref<2x32xf32, #tpu.memory_space<vmem>>, vector<2x32xf32>
    tpu.vector_store %arg10[%c0_33, %c0_34], %59 {strides = array<i32>} : memref<2x32xf32, #tpu.memory_space<vmem>>, vector<2x32xf32>,
    %c0_35 = arith.constant 0 : index
    %c0_36 = arith.constant 0 : index
    %61 = vector.load %arg14[%c0_35, %c0_36] : memref<2x32xf32, #tpu.memory_space<vmem>>, vector<2x32xf32>
    %c0_37 = arith.constant 0 : index
    %c0_38 = arith.constant 0 : index
    %62 = vector.load %arg11[%c0_37, %c0_38] : memref<2x32xf32, #tpu.memory_space<vmem>>, vector<2x32xf32>
    tpu.vector_store %arg11[%c0_37, %c0_38], %61 {strides = array<i32>} : memref<2x32xf32, #tpu.memory_space<vmem>>, vector<2x32xf32>,
    return
  }
  func.func @transform_0(%arg0: i32) -> (i32, i32) {
    %c0_i32 = arith.constant 0 : i32
    %c0_i32_0 = arith.constant 0 : i32
    %c0_i32_1 = arith.constant 0 : i32
    return %c0_i32, %c0_i32_0 : i32, i32
  }
  func.func @transform_1(%arg0: i32) -> (i32, i32) {
    %c0_i32 = arith.constant 0 : i32
    %c0_i32_0 = arith.constant 0 : i32
    %c0_i32_1 = arith.constant 0 : i32
    return %c0_i32, %c0_i32_0 : i32, i32
  }
  func.func @transform_2(%arg0: i32) -> (i32, i32) {
    %c0_i32 = arith.constant 0 : i32
    %c0_i32_0 = arith.constant 0 : i32
    %c0_i32_1 = arith.constant 0 : i32
    return %c0_i32, %c0_i32_0 : i32, i32
  }
  func.func @transform_3(%arg0: i32) -> (i32, i32) {
    %c0_i32 = arith.constant 0 : i32
    %c0_i32_0 = arith.constant 0 : i32
    %c0_i32_1 = arith.constant 0 : i32
    return %c0_i32, %c0_i32_0 : i32, i32
  }
  func.func @transform_4(%arg0: i32) -> (i32, i32) {
    %c0_i32 = arith.constant 0 : i32
    %c0_i32_0 = arith.constant 0 : i32
    %c0_i32_1 = arith.constant 0 : i32
    return %c0_i32, %c0_i32_0 : i32, i32
  }
  func.func @transform_5(%arg0: i32) -> (i32, i32) {
    %c0_i32 = arith.constant 0 : i32
    %c0_i32_0 = arith.constant 0 : i32
    %c0_i32_1 = arith.constant 0 : i32
    return %c0_i32, %c0_i32_0 : i32, i32
  }
  func.func @transform_6(%arg0: i32) -> (i32, i32) {
    %c0_i32 = arith.constant 0 : i32
    %c0_i32_0 = arith.constant 0 : i32
    %c0_i32_1 = arith.constant 0 : i32
    return %c0_i32, %c0_i32_0 : i32, i32
  }
  func.func @transform_7(%arg0: i32) -> (i32, i32) {
    %c0_i32 = arith.constant 0 : i32
    %c0_i32_0 = arith.constant 0 : i32
    %c0_i32_1 = arith.constant 0 : i32
    return %c0_i32, %c0_i32_0 : i32, i32
  }
  func.func @transform_8(%arg0: i32) -> (i32, i32) {
    %c0_i32 = arith.constant 0 : i32
    %c0_i32_0 = arith.constant 0 : i32
    return %c0_i32, %arg0 : i32, i32
  }
  func.func @transform_9(%arg0: i32) -> (i32, i32) {
    %c0_i32 = arith.constant 0 : i32
    %c0_i32_0 = arith.constant 0 : i32
    %c0_i32_1 = arith.constant 0 : i32
    return %c0_i32, %c0_i32_0 : i32, i32
  }
  func.func @transform_10(%arg0: i32) -> (i32, i32) {
    %c0_i32 = arith.constant 0 : i32
    %c0_i32_0 = arith.constant 0 : i32
    %c0_i32_1 = arith.constant 0 : i32
    return %c0_i32, %c0_i32_0 : i32, i32
  }
}

</mosaic_0001>

<bundles_post_ra>
// kernel: tpu_custom_call.1
= control target key start
LH: loop header
LB: loop body
LE: loop exit
PB: predicated region body
PF: predicated region fallthrough
CT: control target
= control target key end

     0   :  { %s490_s0 = inlined_call_operand.vmem [shape: f32[2,1], index: 0, kind: input, shape index: {}]   ;;  %s491_s1 = inlined_call_operand.vmem [shape: f32[2,32], index: 1, kind: input, shape index: {}]   ;;  %s492_s2 = inlined_call_operand.vmem [shape: f32[2,32], index: 2, kind: input, shape index: {}]   ;;  %s493_s3 = inlined_call_operand.vmem [shape: f32[1,128], index: 3, kind: input, shape index: {}]   ;;  %s494_s4 = inlined_call_operand.hbm [shape: f32[32,128], index: 4, kind: input, shape index: {}]   ;;  %s495_s5 = inlined_call_operand.vmem [shape: f32[1,128], index: 5, kind: input, shape index: {}]   ;;  %s496_s6 = inlined_call_operand.vmem [shape: f32[1,32], index: 6, kind: input, shape index: {}]   ;;  %s497_s7 = inlined_call_operand.<no memory space> [shape: f32[1,1], index: 7, kind: input, shape index: {}]   ;;  %s498_s8 = inlined_call_operand.vmem [shape: f32[2,1], index: 8, kind: output, shape index: {0}]   ;;  %s499_s9 = inlined_call_operand.hbm [shape: f32[2,32], index: 9, kind: output, shape index: {1}]   ;;  %s500_s10 = inlined_call_operand.hbm [shape: f32[2,32], index: 10, kind: output, shape index: {2}]  }
   0x1   :  { %v16_v0 = vstv %s497_s7 }
   0x2   :  { %17 = vst [vmem:[#allocation5] sm:$0x1] %v16_v0 }
   0x3   :  { %18 = vsyncpa [#allocation7], 0 }
   0x4   :  { %19 = vsyncpa [#allocation8], 0 }
   0x5   :  { %20 = vsyncpa [#allocation11], 0  ;;  %s377_s15 = smov [#allocation6]  }
   0x6   :  { %s34_s16 = sshll.u32 %s377_s15, 4  ;;  %s35_s16 = int_to_ptr.vmem [resolvable:$true] %s34_s16 }
   0x7   :  { %s319_s17 = scalar_lea.vmem %s35_s16, 512  ;;  %p324_p1 = scmp.lt.s32.totalorder %s35_s16, %s35_s16 }
   0x8   :  { %p320_p0 = scmp.ne.s32.totalorder %s35_s16, %s319_s17  ;;  %p325_p2 = scmp.lt.s32.totalorder %s319_s17, %s319_s17 }
   0xa   :  { %p326_p3 = por %p325_p2, %p324_p1 }
   0xc   :  { %p327_p4 = pnand %p326_p3, %p320_p0 }
   0xe   :  { %330 = shalt.err (!%p327_p4)
}
   0xf   :  { %s378_s18 = smov 128   ;;  %s379_s19 = smov 8  }
  0x10   :  { %40 = dma.hbm_to_vmem [thread:$0]  %s494_s4, 512, %s35_s16, [#allocation7], %s378_s18, %s378_s18, %s379_s19  }
  0x11   :  { %371 = dma.done.wait [#allocation7], 512  }
  0x12   :  { %372 = vsyncadd [#allocation7], 4294966784  ;;  %v380_v1 = vmov 0.0   ;;  %vm381_vm0 = vmmov 0   ;;  %v382_v2 = vmov 0   ;;  %vm58_vm1 = vcmask 254976  }
  0x13   :  { %280 = vmatprep.subr.mxu0 %v380_v1  ;;  %288 = vmatprep.mubr.msk.f32.mxu0 %vm381_vm0, %v380_v1  ;;  %vm55_vm2 = vcmask 1024   ;;  %v66_v3 = vld [vmem:[#allocation6 + $0x18] sm:$0xff]  ;;  %v65_v4 = vld [vmem:[#allocation6 + $0x10] sm:$0xff]  ;;  %v64_v7 = vld [vmem:[#allocation6 + $0x8] sm:$0xff]  ;;  %vm97_vm3 = vcmask 261120   ;;  %s384_s28 = smov 64  }
  0x14   :  { %302 = vset.pattern.permute.xlu0 %v382_v2  ;;  %281 = vmatpush3.msra.mxu0 %v66_v3  ;;  %v57_v5 = vld [vmem:[%s491_s1] sm:$0x3]  ;;  %v63_v9 = vld [vmem:[#allocation6] sm:$0xff]  ;;  %s385_s29 = smov 96   ;;  %s387_s11 = smov [#allocation10]  }
  0x15   :  { %v54_v6 = vld [vmem:[%s490_s0] sm:$0x3]  ;;  %282 = vmatprep.subr.mxu0 %v380_v1  ;;  %59 = vst.msk [vmem:[#allocation3] sm:$0x3] %vm58_vm1, %v57_v5  ;;  %s383_s0 = smov 32   ;;  %s254_s12 = sshll.u32 %s387_s11, 4  ;;  %s255_s12 = int_to_ptr.vmem [resolvable:$true] %s254_s12 }
  0x16   :  { %56 = vst.msk [vmem:[#allocation2] sm:$0x3] %vm55_vm2, %v54_v6  ;;  %v60_v8 = vld [vmem:[%s492_s2] sm:$0x3]  ;;  %283 = vmatpush3.msra.mxu0 %v65_v4 }
  0x17   :  { %61 = vst.msk [vmem:[#allocation4] sm:$0x3] %vm58_vm1, %v60_v8  ;;  %284 = vmatprep.subr.mxu0 %v380_v1  ;;  %v271_v13 = vld [vmem:[%s493_s3] ss:$0 sm:$0xff] }
  0x18   :  { %285 = vmatpush3.msra.mxu0 %v64_v7  ;;  %v269_v16 = vld [vmem:[%s495_s5] ss:$0 sm:$0xff] }
  0x19   :  { %286 = vmatprep.subr.mxu0 %v380_v1  ;;  %v274_v28 = vld [vmem:[%s496_s6] ss:$0 sm:$0xff]  ;;  %s386_s6 = smov [#allocation9]  }
  0x1a   :  { %287 = vmatpush3.msra.mxu0 %v63_v9  ;;  %s244_s30 = sshll.u32 %s386_s6, 4  ;;  %s245_s30 = int_to_ptr.vmem [resolvable:$true] %s244_s30 }
  0x1b   :  { %s331_s13 = scalar_lea.vmem %s245_s30, 32  ;;  %p336_p6 = scmp.lt.s32.totalorder %s245_s30, %s245_s30 }
  0x1c   :  { %v83_v10 = vld [vmem:[#allocation3] sm:$0x3]  ;;  %p332_p5 = scmp.ne.s32.totalorder %s245_s30, %s331_s13  ;;  %p337_p7 = scmp.lt.s32.totalorder %s331_s13, %s331_s13 }
  0x1d   :  { %v82_v11 = vld [vmem:[#allocation2] sm:$0x3]  ;;  %289 = vmatmul.mubr.msk.f32.vlgmr.msra.gmra.mxu0 %vm97_vm3, %v83_v10 }
  0x1e   :  { %87 = vperm.xlu0 %302, %v82_v11   ;;  %v84_v12 = vld [vmem:[#allocation4] sm:$0x3]  ;;  %p338_p8 = por %p337_p7, %p336_p6 }
  0x1f   :  { %181 = vrot.lane.b32.xlu1 %v84_v12, %s383_s0 }
  0x20   :  { %p339_p9 = pnand %p338_p8, %p332_p5 }
  0x91   :  { %v182_v29 = vpop.permute.xlu1 %181 }
  0x99   :  { %v88_v14 = vpop.permute.xlu0 %87 }
  0x9a   :  { %v96_v15 = vmul.f32 %v271_v13, %v88_v14 }
  0xdd   :  { %v167_v17 = vpop.f32.mrf.mxu0 }
  0xde   :  { %v171_v18 = vadd.f32 %v167_v17, %v96_v15 }
  0xdf   :  { %v290_v19 = vpop.f32.mrf.mxu0 }
  0xe0   :  { %v172_v20 = vadd.f32 %v269_v16, %v171_v18 }
  0xe2   :  { %303 = vtanh.f32 %v172_v20  ;;  %v273_v22 = vmul.f32 -1.442695, %v172_v20 }
  0xe4   :  { %305 = vpow2.f32 %v273_v22 }
  0xef   :  { %v304_v21 = vpop.eup %303 }
  0xf0   :  { %186 = vrot.lane.b32.xlu0 %v304_v21, %s384_s28 }
  0xf1   :  { %v306_v23 = vpop.eup %305 }
  0xf2   :  { %v176_v24 = vadd.f32 1.0, %v306_v23 }
  0xf4   :  { %307 = vrcp.f32 %v176_v24 }
 0x101   :  { %v308_v25 = vpop.eup %307 }
 0x102   :  { %v184_v30 = vmul.f32 %v308_v25, %v182_v29 }
 0x162   :  { %v187_v26 = vpop.permute.xlu0 %186 }
 0x163   :  { %v189_v27 = vmul.f32 %v308_v25, %v187_v26 }
 0x165   :  { %191 = vrot.lane.b32.xlu1 %v189_v27, %s383_s0 }
 0x169   :  { %206 = vrot.lane.b32.xlu1 %v274_v28, %s385_s29 }
 0x1d7   :  { %v192_v31 = vpop.permute.xlu1 %191 }
 0x1d8   :  { %v194_v32 = vadd.f32 %v192_v31, %v184_v30 }
 0x1da   :  { %309 = vtanh.f32 %v194_v32 }
 0x1db   :  { %v207_v35 = vpop.permute.xlu1 %206 }
 0x1e7   :  { %v310_v33 = vpop.eup %309 }
 0x1e8   :  { %197 = vrot.lane.b32.xlu0 %v310_v33, %s384_s28 }
 0x25a   :  { %v198_v34 = vpop.permute.xlu0 %197 }
 0x25b   :  { %v200_v36 = vmul.f32 %v308_v25, %v198_v34 }
 0x25d   :  { %v209_v37 = vmul.f32 %v207_v35, %v200_v36 }
 0x25f   :  { %211 = vrot.lane.b32.xlu0 %v209_v37, %s383_s0 }
 0x263   :  { %220 = vrot.lane.b32.xlu0 %v200_v36, %s383_s0 }
 0x267   :  { %225 = vrot.lane.b32.xlu0 %v194_v32, %s385_s29 }
 0x2d1   :  { %v212_v38 = vpop.permute.xlu0 %211 }
 0x2d2   :  { %v215_v39 = vsel %vm58_vm1, %v212_v38, 0.0 }
 0x2d3   :  { %216 = vadd.xlane.f32.xlu1 %v215_v39 }
 0x2d5   :  { %v221_v40 = vpop.permute.xlu0 %220 }
 0x2d6   :  { %223 = vst.msk [vmem:[#allocation3] sm:$0x3] %vm58_vm1, %v221_v40 }
 0x2d9   :  { %v226_v41 = vpop.permute.xlu0 %225 }
 0x2da   :  { %228 = vst.msk [vmem:[#allocation4] sm:$0x3] %vm58_vm1, %v226_v41 }
 0x2dd   :  { %v232_v42 = vld [vmem:[#allocation3] sm:$0x3] }
 0x2de   :  { %233 = vst.msk [vmem:[#allocation9] sm:$0x3] %vm58_vm1, %v232_v42 }
 0x2df   :  { %342 = shalt.err (!%p339_p9)
}
 0x2e0   :  { %247 = dma.vmem_to_hbm [thread:$0]  %s245_s30, 32, %s499_s9, [#allocation8]  }
 0x2e1   :  { %v234_v43 = vld [vmem:[#allocation4] sm:$0x3]  ;;  %s351_s16 = scalar_lea.vmem %s255_s12, 32  ;;  %p356_p11 = scmp.lt.s32.totalorder %s255_s12, %s255_s12 }
 0x2e2   :  { %235 = vst.msk [vmem:[#allocation10] sm:$0x3] %vm58_vm1, %v234_v43  ;;  %p352_p10 = scmp.ne.s32.totalorder %s255_s12, %s351_s16  ;;  %p357_p12 = scmp.lt.s32.totalorder %s351_s16, %s351_s16 }
 0x2e4   :  { %p358_p13 = por %p357_p12, %p356_p11 }
 0x2e6   :  { %p359_p0 = pnand %p358_p13, %p352_p10 }
 0x2e8   :  { %362 = shalt.err (!%p359_p0)
}
 0x2e9   :  { %257 = dma.vmem_to_hbm [thread:$0]  %s255_s12, 32, %s500_s10, [#allocation11]   ;;  %v270_v44 = vld [vmem:[#allocation5] ss:$0 sm:$0xff] }
 0x35c   :  { %v217_v45 = vpop.xlane.xlu1 %216 }
 0x35d   :  { %v218_v46 = vadd.f32 %v270_v44, %v217_v45 }
 0x35f   :  { %230 = vst.msk [vmem:[#allocation2] sm:$0x3] %vm55_vm2, %v218_v46  ;;  %231 = vst.msk [vmem:[%s498_s8] sm:$0x3] %vm55_vm2, %v218_v46 }
 0x360   :  { %373 = dma.done.wait [#allocation8], 32  }
 0x361   :  { %374 = vsyncadd [#allocation8], 4294967264 }
 0x362   :  { %375 = dma.done.wait [#allocation11], 32  }
 0x363   :  { %376 = vsyncadd [#allocation11], 4294967264 }
 0x364   :  { %266 = vsyncpa [#allocation7], 1 }
 0x365   :  { %267 = vsyncpa [#allocation8], 1 }
 0x366   :  { %268 = vsyncpa [#allocation11], 1 }

</bundles_post_ra>
